<compile_context>
chip_gen: v5e
topology: v5e:2x2
jax: 0.10.0
libtpu: 0.0.40
codegen_flags: <defaults>
</compile_context>

<pallas_src>
import functools

import jax
import jax.numpy as jnp
from jax.experimental import pallas as pl
from jax.experimental.pallas import tpu as pltpu


def _round_up(n, m):
    return ((n + m - 1) // m) * m


# Batches >= 2*_MIN_SPLIT are split across >= 2 grid steps (v7x megacore).
_MIN_SPLIT = 256


def _choose_batch_tiling(batch, block_batch):
    """Pick (tile_rows, padded_batch, n_steps).

    Pads batch only to a multiple of 8 and splits it evenly across grid
    steps, so worst-case waste is < 8 dead rows per step (instead of up to
    tile-8 rows).  Forces >= 2 steps for large batches so both v7x
    TensorCores are used.
    """
    b8 = _round_up(batch, 8)
    n_steps = max(1, -(-b8 // block_batch))
    if n_steps == 1 and b8 >= 2 * _MIN_SPLIT:
        n_steps = 2
    tb = _round_up(-(-b8 // n_steps), 8)
    return tb, tb * n_steps, n_steps


def _fc_stack(x_ref, w1_ref, b1_ref, w2_ref, b2_ref):
    """fc1 -> ReLU -> fc2, f32 accumulation. Returns (tb, a_pad) float32."""
    x = x_ref[...]
    if x.dtype != w1_ref.dtype:            # bf16 MXU path (params stored bf16)
        x = x.astype(w1_ref.dtype)
    # fc1: (TB, S) @ (S, H) on the MXU.  With S padded to 8/16 this is mostly
    # weight-push latency; a VPU broadcast-MAC over the few real state
    # features could beat it, but fc2 dominates MXU time — decide via bundle
    # dump before changing.
    h = jnp.dot(x, w1_ref[...], preferred_element_type=jnp.float32)
    h = jnp.maximum(h + b1_ref[...], 0.0)  # bias + ReLU in f32 (v5e: no bf16 VPU)
    if h.dtype != w2_ref.dtype:
        h = h.astype(w2_ref.dtype)
    # fc2: (TB, H) @ (H, A_pad), f32 accumulation.
    return jnp.dot(h, w2_ref[...], preferred_element_type=jnp.float32) + b2_ref[...]


def qnet_kernel(x_ref, w1_ref, b1_ref, w2_ref, b2_ref, o_ref):
    o_ref[...] = _fc_stack(x_ref, w1_ref, b1_ref, w2_ref, b2_ref).astype(o_ref.dtype)


def qnet_argmax_kernel(x_ref, w1_ref, b1_ref, w2_ref, b2_ref, o_ref, *, action_dim):
    """Fused consumer: per-row argmax over real actions -> (tb, 1) int32.

    Eliminates the 64x-inflated padded Q writeback for the act-selection path.
    Padded action lanes are masked to -inf; padded batch rows are garbage but
    are sliced off by the wrapper.
    """
    q = _fc_stack(x_ref, w1_ref, b1_ref, w2_ref, b2_ref)
    lane = jax.lax.broadcasted_iota(jnp.int32, q.shape, 1)
    q = jnp.where(lane < action_dim, q, -jnp.inf)
    q_max = jnp.max(q, axis=-1, keepdims=True)
    # First index attaining the max (matches argmax tie-breaking); built from
    # plain min/where reductions to keep the Mosaic lowering simple.
    idx = jnp.min(jnp.where(q == q_max, lane, q.shape[-1]), axis=-1, keepdims=True)
    o_ref[...] = idx.astype(jnp.int32)


def prepare_qnet_params(w1, b1, w2, b2, *, param_dtype=jnp.bfloat16):
    """One-time layout transform of PyTorch-style (out, in) params.

    Weights -> zero-padded (in_pad, out_pad) so the kernel never transposes
    and every lane dim is 128/256-dense.  bf16 params by default on all
    generations (f32 accumulation in-kernel); pass jnp.float32 for exact
    f32 matmuls.
    """
    hidden_dim, state_dim = w1.shape
    action_dim = w2.shape[0]
    sub = 16 if jnp.dtype(param_dtype).itemsize == 2 else 8
    s_pad = _round_up(state_dim, sub)                       # contraction (sublane) dim
    h_pad = 128 if hidden_dim <= 128 else _round_up(hidden_dim, 256)  # v6e/v7x MXU width
    a_pad = _round_up(action_dim, 128)                      # lane-dense output

    w1_t = jnp.zeros((s_pad, h_pad), param_dtype)
    w1_t = w1_t.at[:state_dim, :hidden_dim].set(w1.T.astype(param_dtype))
    b1_p = jnp.zeros((1, h_pad), jnp.float32)
    b1_p = b1_p.at[:, :hidden_dim].set(b1.reshape(1, -1).astype(jnp.float32))
    w2_t = jnp.zeros((h_pad, a_pad), param_dtype)
    w2_t = w2_t.at[:hidden_dim, :action_dim].set(w2.T.astype(param_dtype))
    b2_p = jnp.zeros((1, a_pad), jnp.float32)
    b2_p = b2_p.at[:, :action_dim].set(b2.reshape(1, -1).astype(jnp.float32))

    dims = (state_dim, hidden_dim, action_dim, s_pad, h_pad, a_pad)
    return (w1_t, b1_p, w2_t, b2_p), dims


def _qnet_pallas_call(kernel, x, params, dims, block_batch, out_dtype, out_cols):
    w1_t, b1_p, w2_t, b2_p = params
    state_dim, hidden_dim, action_dim, s_pad, h_pad, a_pad = dims
    batch = x.shape[0]
    tb, b_pad, n_steps = _choose_batch_tiling(batch, block_batch)

    x_p = jnp.zeros((b_pad, s_pad), x.dtype).at[:batch, :state_dim].set(x)

    # VMEM at tb=2048 f32: x 2048x16 (128 KiB) + out 2048x128 (1 MiB), double
    # buffered, + resident weights/biases (< 50 KiB bf16) ~= 2.4 MiB — far
    # under the 32 MiB scoped default on every generation (and v7x's 64 MiB
    # physical), so no vmem_limit_bytes override is needed.
    out = pl.pallas_call(
        kernel,
        out_shape=jax.ShapeDtypeStruct((b_pad, out_cols), out_dtype),
        grid_spec=pltpu.PrefetchScalarGridSpec(
            num_scalar_prefetch=0,
            grid=(n_steps,),
            in_specs=[
                # x: one batch tile per grid step (auto double-buffered).
                pl.BlockSpec((tb, s_pad), lambda i: (i, 0),
                             memory_space=pltpu.MemorySpace.VMEM),
                # Weights / biases: same block every step -> VMEM-resident.
                pl.BlockSpec((s_pad, h_pad), lambda i: (0, 0),
                             memory_space=pltpu.MemorySpace.VMEM),
                pl.BlockSpec((1, h_pad), lambda i: (0, 0),
                             memory_space=pltpu.MemorySpace.VMEM),
                pl.BlockSpec((h_pad, a_pad), lambda i: (0, 0),
                             memory_space=pltpu.MemorySpace.VMEM),
                pl.BlockSpec((1, a_pad), lambda i: (0, 0),
                             memory_space=pltpu.MemorySpace.VMEM),
            ],
            out_specs=pl.BlockSpec((tb, out_cols), lambda i: (i, 0),
                                   memory_space=pltpu.MemorySpace.VMEM),
        ),
        compiler_params=pltpu.CompilerParams(
            # Batch tiles are independent -> megacore-shard on v7x's 2 TCs.
            dimension_semantics=("parallel",),
        ),
    )(x_p, w1_t, b1_p, w2_t, b2_p)
    return out, batch


@functools.partial(jax.jit, static_argnames=("dims", "block_batch", "out_dtype"))
def qnet_forward(x, params, dims, *, block_batch=2048, out_dtype=jnp.float32):
    """Qnet forward: returns (batch, action_dim) Q-values in `out_dtype`."""
    action_dim, a_pad = dims[2], dims[5]
    out, batch = _qnet_pallas_call(qnet_kernel, x, params, dims,
                                   block_batch, out_dtype, a_pad)
    return out[:batch, :action_dim]


@functools.partial(jax.jit, static_argnames=("dims", "block_batch"))
def qnet_select_action(x, params, dims, *, block_batch=2048):
    """Fused forward + greedy action: returns (batch,) int32 argmax_a Q(s,a)."""
    action_dim = dims[2]
    kernel = functools.partial(qnet_argmax_kernel, action_dim=action_dim)
    out, batch = _qnet_pallas_call(kernel, x, params, dims,
                                   block_batch, jnp.int32, 1)
    return out[:batch, 0]


def init_qnet_params(key, state_dim, hidden_dim, action_dim):
    """torch.nn.Linear-style init: U(-1/sqrt(fan_in), 1/sqrt(fan_in))."""
    k1, k2, k3, k4 = jax.random.split(key, 4)
    bound1 = 1.0 / (state_dim ** 0.5)
    bound2 = 1.0 / (hidden_dim ** 0.5)
    w1 = jax.random.uniform(k1, (hidden_dim, state_dim), jnp.float32, -bound1, bound1)
    b1 = jax.random.uniform(k2, (hidden_dim,), jnp.float32, -bound1, bound1)
    w2 = jax.random.uniform(k3, (action_dim, hidden_dim), jnp.float32, -bound2, bound2)
    b2 = jax.random.uniform(k4, (action_dim,), jnp.float32, -bound2, bound2)
    return w1, b1, w2, b2


if __name__ == "__main__":
    key = jax.random.PRNGKey(0)
    k_x1, k_x2, k_p = jax.random.split(key, 3)

    state_dim, hidden_dim, action_dim = 4, 32, 2
    w1, b1, w2, b2 = init_qnet_params(k_p, state_dim, hidden_dim, action_dim)

    def ref_forward(x):
        return jnp.maximum(x @ w1.T + b1, 0.0) @ w2.T + b2

    # --- Exact f32-param path, small RL-style batch (single grid step). -----
    params_f32, dims_f32 = prepare_qnet_params(w1, b1, w2, b2,
                                               param_dtype=jnp.float32)
    x_small = jax.random.normal(k_x1, (8, state_dim), jnp.float32)
    out_small = qnet_forward(x_small, params_f32, dims_f32)
    jax.block_until_ready(out_small)
    assert out_small.shape == (8, action_dim)
    assert jnp.allclose(out_small, ref_forward(x_small), atol=1e-4, rtol=1e-4)

    # --- Default bf16-param path, larger batch (even 2-way grid split). -----
    params_bf16, dims_bf16 = prepare_qnet_params(w1, b1, w2, b2)   # bf16 default
    x_big = jax.random.normal(k_x2, (600, state_dim), jnp.float32)
    out_big = qnet_forward(x_big, params_bf16, dims_bf16)
    jax.block_until_ready(out_big)
    assert out_big.shape == (600, action_dim)
    # bf16 params round inputs/weights (not just accumulation) -> looser tol.
    assert jnp.allclose(out_big, ref_forward(x_big), atol=5e-2, rtol=5e-2)

    # --- Fused in-kernel argmax (writeback-free act selection). -------------
    act = qnet_select_action(x_big, params_bf16, dims_bf16)
    jax.block_until_ready(act)
    assert act.shape == (600,)
    ref_q = ref_forward(x_big)
    ref_act = jnp.argmax(ref_q, axis=-1)
    sorted_q = jnp.sort(ref_q, axis=-1)
    gap = sorted_q[:, -1] - sorted_q[:, -2]
    # bf16 rounding may flip the argmax only when the two Q-values nearly tie.
    assert bool(jnp.all((act == ref_act) | (gap < 5e-2)))

    print("KERNEL_OK")
</pallas_src>

<mosaic_0001>
module attributes {stable_mosaic.version = 11 : i64} {
  func.func @qnet_kernel(%arg0: i32, %arg1: memref<8x8xf32, #tpu.memory_space<vmem>>, %arg2: memref<8x128xf32, #tpu.memory_space<vmem>>, %arg3: memref<1x128xf32, #tpu.memory_space<vmem>>, %arg4: memref<128x128xf32, #tpu.memory_space<vmem>>, %arg5: memref<1x128xf32, #tpu.memory_space<vmem>>, %arg6: memref<8x128xf32, #tpu.memory_space<vmem>>) attributes {dimension_semantics = [#tpu.dimension_semantics<parallel>], iteration_bounds = array<i64: 1>, scalar_prefetch = 0 : i64, scratch_operands = 0 : i64, tpu.core_type = #tpu.core_type<tc>, window_params = [{transform_indices = @transform_0, window_bounds = array<i64: 8, 8>}, {pipeline_mode = #tpu.pipeline_mode<synchronous>, transform_indices = @transform_1, window_bounds = array<i64: 8, 128>}, {pipeline_mode = #tpu.pipeline_mode<synchronous>, transform_indices = @transform_2, window_bounds = array<i64: 1, 128>}, {pipeline_mode = #tpu.pipeline_mode<synchronous>, transform_indices = @transform_3, window_bounds = array<i64: 128, 128>}, {pipeline_mode = #tpu.pipeline_mode<synchronous>, transform_indices = @transform_4, window_bounds = array<i64: 1, 128>}, {transform_indices = @transform_5, window_bounds = array<i64: 8, 128>}]} {
    %c0 = arith.constant 0 : index
    %c0_0 = arith.constant 0 : index
    %0 = vector.load %arg1[%c0, %c0_0] : memref<8x8xf32, #tpu.memory_space<vmem>>, vector<8x8xf32>
    %c0_1 = arith.constant 0 : index
    %c0_2 = arith.constant 0 : index
    %1 = vector.load %arg2[%c0_1, %c0_2] : memref<8x128xf32, #tpu.memory_space<vmem>>, vector<8x128xf32>
    %cst = arith.constant dense<0.000000e+00> : vector<8x128xf32>
    %2 = tpu.matmul %0, %1, %cst {dimension_numbers = #tpu.dot_dimension_numbers<[1], [0], [0], [1], [0, 0, 1, 1], [], []>} : vector<8x8xf32>, vector<8x128xf32>, vector<8x128xf32> -> vector<8x128xf32>
    %c0_3 = arith.constant 0 : index
    %c0_4 = arith.constant 0 : index
    %3 = vector.load %arg3[%c0_3, %c0_4] : memref<1x128xf32, #tpu.memory_space<vmem>>, vector<1x128xf32>
    %4 = vector.broadcast %3 : vector<1x128xf32> to vector<8x128xf32>
    %5 = arith.addf %2, %4 : vector<8x128xf32>
    %cst_5 = arith.constant 0.000000e+00 : f32
    %6 = vector.broadcast %cst_5 : f32 to vector<8x128xf32>
    %7 = arith.maximumf %5, %6 : vector<8x128xf32>
    %c0_6 = arith.constant 0 : index
    %c0_7 = arith.constant 0 : index
    %8 = vector.load %arg4[%c0_6, %c0_7] : memref<128x128xf32, #tpu.memory_space<vmem>>, vector<128x128xf32>
    %cst_8 = arith.constant dense<0.000000e+00> : vector<8x128xf32>
    %9 = tpu.matmul %7, %8, %cst_8 {dimension_numbers = #tpu.dot_dimension_numbers<[1], [0], [0], [1], [0, 0, 1, 1], [], []>} : vector<8x128xf32>, vector<128x128xf32>, vector<8x128xf32> -> vector<8x128xf32>
    %c0_9 = arith.constant 0 : index
    %c0_10 = arith.constant 0 : index
    %10 = vector.load %arg5[%c0_9, %c0_10] : memref<1x128xf32, #tpu.memory_space<vmem>>, vector<1x128xf32>
    %11 = vector.broadcast %10 : vector<1x128xf32> to vector<8x128xf32>
    %12 = arith.addf %9, %11 : vector<8x128xf32>
    %c0_11 = arith.constant 0 : index
    %c0_12 = arith.constant 0 : index
    %13 = vector.load %arg6[%c0_11, %c0_12] : memref<8x128xf32, #tpu.memory_space<vmem>>, vector<8x128xf32>
    tpu.vector_store %arg6[%c0_11, %c0_12], %12 {strides = array<i32>} : memref<8x128xf32, #tpu.memory_space<vmem>>, vector<8x128xf32>,
    return
  }
  func.func @transform_0(%arg0: i32) -> (i32, i32) {
    %c0_i32 = arith.constant 0 : i32
    %c0_i32_0 = arith.constant 0 : i32
    return %arg0, %c0_i32 : i32, i32
  }
  func.func @transform_1(%arg0: i32) -> (i32, i32) {
    %c0_i32 = arith.constant 0 : i32
    %c0_i32_0 = arith.constant 0 : i32
    %c0_i32_1 = arith.constant 0 : i32
    return %c0_i32, %c0_i32_0 : i32, i32
  }
  func.func @transform_2(%arg0: i32) -> (i32, i32) {
    %c0_i32 = arith.constant 0 : i32
    %c0_i32_0 = arith.constant 0 : i32
    %c0_i32_1 = arith.constant 0 : i32
    return %c0_i32, %c0_i32_0 : i32, i32
  }
  func.func @transform_3(%arg0: i32) -> (i32, i32) {
    %c0_i32 = arith.constant 0 : i32
    %c0_i32_0 = arith.constant 0 : i32
    %c0_i32_1 = arith.constant 0 : i32
    return %c0_i32, %c0_i32_0 : i32, i32
  }
  func.func @transform_4(%arg0: i32) -> (i32, i32) {
    %c0_i32 = arith.constant 0 : i32
    %c0_i32_0 = arith.constant 0 : i32
    %c0_i32_1 = arith.constant 0 : i32
    return %c0_i32, %c0_i32_0 : i32, i32
  }
  func.func @transform_5(%arg0: i32) -> (i32, i32) {
    %c0_i32 = arith.constant 0 : i32
    %c0_i32_0 = arith.constant 0 : i32
    return %arg0, %c0_i32 : i32, i32
  }
}

</mosaic_0001>

<bundles_post_ra>
// kernel: qnet_forward.1
= control target key start
LH: loop header
LB: loop body
LE: loop exit
PB: predicated region body
PF: predicated region fallthrough
CT: control target
= control target key end

     0   :  { %10 = vsyncpa [#allocation3], 0  ;;  %s145_s21 = smov [#allocation2]   ;;  %s146_s23 = smov 128   ;;  %s196_s0 = inlined_call_operand.vmem [shape: f32[8,8], index: 0, kind: input, shape index: {}]   ;;  %s197_s1 = inlined_call_operand.vmem [shape: f32[8,128], index: 1, kind: input, shape index: {}]   ;;  %s198_s2 = inlined_call_operand.vmem [shape: f32[1,128], index: 2, kind: input, shape index: {}]   ;;  %s199_s3 = inlined_call_operand.hbm [shape: f32[128,128], index: 3, kind: input, shape index: {}]   ;;  %s200_s4 = inlined_call_operand.vmem [shape: f32[1,128], index: 4, kind: input, shape index: {}]   ;;  %s201_s5 = inlined_call_operand.vmem [shape: f32[8,128], index: 5, kind: output, shape index: {}]  }
   0x1   :  { %s21_s20 = sshll.u32 %s199_s3, 4  ;;  %s23_s22 = sshll.u32 %s145_s21, 4  ;;  %s22_s20 = int_to_ptr.hbm [resolvable:$true] %s21_s20  ;;  %s24_s22 = int_to_ptr.vmem [resolvable:$true] %s23_s22 }
   0x2   :  { %s147_s24 = smov 8  }
   0x3   :  { %29 = dma.hbm_to_vmem [thread:$0]  %s22_s20, 2048, %s24_s22, [#allocation3], %s146_s23, %s146_s23, %s147_s24  }
   0x4   :  { %143 = dma.done.wait [#allocation3], 2048  }
   0x5   :  { %144 = vsyncadd [#allocation3], 4294965248  ;;  %vm42_vm0 = vcmask 64512   ;;  %v37_v0 = vld [vmem:[%s197_s1] sm:$0xff]  ;;  %v82_v2 = vld [vmem:[#allocation2 + $0x78] sm:$0xff] }
   0x6   :  { %v36_v1 = vld [vmem:[%s196_s0] sm:$0xff]  ;;  %61 = vmatpush.msra.mxu0 %v37_v0  ;;  %87 = vmatpush.msra.mxu1 %v82_v2  ;;  %v81_v3 = vld [vmem:[#allocation2 + $0x70] sm:$0xff]  ;;  %v80_v4 = vld [vmem:[#allocation2 + $0x68] sm:$0xff] }
   0x7   :  { %113 = vmatmul.msk.f32.vlgmr.msra.gmra.mxu0 %vm42_vm0, %v36_v1  ;;  %v79_v5 = vld [vmem:[#allocation2 + $0x60] sm:$0xff]  ;;  %v78_v6 = vld [vmem:[#allocation2 + $0x58] sm:$0xff]  ;;  %v77_v7 = vld [vmem:[#allocation2 + $0x50] sm:$0xff] }
   0x8   :  { %88 = vmatpush.msra.mxu1 %v81_v3  ;;  %v76_v8 = vld [vmem:[#allocation2 + $0x48] sm:$0xff]  ;;  %v75_v9 = vld [vmem:[#allocation2 + $0x40] sm:$0xff]  ;;  %v74_v10 = vld [vmem:[#allocation2 + $0x38] sm:$0xff] }
   0x9   :  { %v73_v11 = vld [vmem:[#allocation2 + $0x30] sm:$0xff]  ;;  %v72_v12 = vld [vmem:[#allocation2 + $0x28] sm:$0xff]  ;;  %v71_v13 = vld [vmem:[#allocation2 + $0x20] sm:$0xff] }
   0xa   :  { %89 = vmatpush.msra.mxu1 %v80_v4  ;;  %v70_v14 = vld [vmem:[#allocation2 + $0x18] sm:$0xff]  ;;  %v69_v15 = vld [vmem:[#allocation2 + $0x10] sm:$0xff]  ;;  %v68_v16 = vld [vmem:[#allocation2 + $0x8] sm:$0xff] }
   0xb   :  { %v67_v17 = vld [vmem:[#allocation2] sm:$0xff] }
   0xc   :  { %90 = vmatpush.msra.mxu1 %v79_v5  ;;  %v117_v18 = vld [vmem:[%s198_s2] ss:$0 sm:$0xff] }
   0xd   :  { %v118_v22 = vld [vmem:[%s200_s4] ss:$0 sm:$0xff] }
   0xe   :  { %91 = vmatpush.msra.mxu1 %v78_v6 }
  0x10   :  { %92 = vmatpush.msra.mxu1 %v77_v7 }
  0x12   :  { %93 = vmatpush.msra.mxu1 %v76_v8 }
  0x14   :  { %94 = vmatpush.msra.mxu1 %v75_v9 }
  0x16   :  { %95 = vmatpush.msra.mxu1 %v74_v10 }
  0x18   :  { %96 = vmatpush.msra.mxu1 %v73_v11 }
  0x1a   :  { %97 = vmatpush.msra.mxu1 %v72_v12 }
  0x1c   :  { %98 = vmatpush.msra.mxu1 %v71_v13 }
  0x1e   :  { %99 = vmatpush.msra.mxu1 %v70_v14 }
  0x20   :  { %100 = vmatpush.msra.mxu1 %v69_v15 }
  0x22   :  { %101 = vmatpush.msra.mxu1 %v68_v16 }
  0x24   :  { %102 = vmatpush.msra.mxu1 %v67_v17 }
  0x84   :  { %v63_v19 = vpop.f32.mrf.mxu0 }
  0x85   :  { %v64_v20 = vadd.f32 %v117_v18, %v63_v19 }
  0x87   :  { %v66_v21 = vmax.f32 %v64_v20, 0.0 }
  0x89   :  { %103 = vmatmul.f32.vlgmr.msra.gmra.mxu1 %v66_v21 }
 0x106   :  { %v104_v23 = vpop.f32.mrf.mxu1 }
 0x107   :  { %v105_v24 = vadd.f32 %v118_v22, %v104_v23 }
 0x109   :  { %107 = vst [vmem:[%s201_s5] sm:$0xff] %v105_v24 }
 0x10a   :  { %112 = vsyncpa [#allocation3], 1 }

</bundles_post_ra>
